<compile_context>
chip_gen: v5e
topology: v5e:2x2
jax: 0.10.0
libtpu: 0.0.40
codegen_flags: <defaults>
</compile_context>

<pallas_src>
import functools

import jax
import jax.numpy as jnp
from jax import lax
from jax.experimental import pallas as pl
from jax.experimental.pallas import tpu as pltpu


def _layernorm_kernel_fold1(x_ref, scale_ref, shift_ref, o_ref, *, eps, emb_dim):
    """One logical row per block row (emb_dim is the lane axis)."""
    x = x_ref[...].astype(jnp.float32)                         # (tm, emb_dim)
    # Independent reductions (no serial mean -> centered -> var dependency).
    sum_x = jnp.sum(x, axis=-1, keepdims=True)                  # (tm, 1)
    sum_sq = jnp.sum(x * x, axis=-1, keepdims=True)              # (tm, 1)
    mean = sum_x * (1.0 / emb_dim)
    # torch.var default is unbiased: divide by N - 1.
    var = (sum_sq - mean * sum_x) * (1.0 / (emb_dim - 1))
    inv_std = lax.rsqrt(var + eps)
    scale = scale_ref[...].astype(jnp.float32)                   # (1, emb_dim)
    shift = shift_ref[...].astype(jnp.float32)
    o_ref[...] = ((x - mean) * inv_std * scale + shift).astype(o_ref.dtype)


def _layernorm_kernel_packed(x_ref, scale_ref, shift_ref, seg_ref, o_ref, *,
                             eps, emb_dim):
    """`fold` logical rows packed along lanes; per-segment stats via a
    grid-resident block-diagonal ones matrix on the otherwise-idle MXU."""
    x = x_ref[...].astype(jnp.float32)                           # (tm, width)
    seg = seg_ref[...]                                           # (width, width) f32
    # Two independent segment reductions (sum_x, sum_sq) -> no serial chain.
    # Keep f32 operands: mixed f32 x bf16 dots are avoided for lowering safety.
    sum_x = jnp.dot(x, seg, preferred_element_type=jnp.float32)   # (tm, width)
    sum_sq = jnp.dot(x * x, seg, preferred_element_type=jnp.float32)
    mean = sum_x * (1.0 / emb_dim)
    var = (sum_sq - mean * sum_x) * (1.0 / (emb_dim - 1))         # unbiased
    inv_std = lax.rsqrt(var + eps)
    scale = scale_ref[...].astype(jnp.float32)                    # (1, width)
    shift = shift_ref[...].astype(jnp.float32)
    o_ref[...] = ((x - mean) * inv_std * scale + shift).astype(o_ref.dtype)


def layernorm_pallas(x, scale, shift, eps=1e-5):
    """x: (..., emb_dim); scale/shift: (emb_dim,)."""
    orig_shape = x.shape
    emb_dim = orig_shape[-1]
    x2 = x.reshape(-1, emb_dim)
    rows = x2.shape[0]

    # ---- Lane-density: fold rows into lanes when emb_dim divides 128 -------
    fold = 1
    pad_rows_tail = 0
    if emb_dim < 128 and 128 % emb_dim == 0:
        fold = 128 // emb_dim
        rem = rows % fold
        if rem:
            # Pad only the tiny tail so the (free) contiguous reshape is legal;
            # the big pad-to-tile-multiple is gone (ragged last grid block).
            pad_rows_tail = fold - rem
    # TODO(synk): emb_dim > 128 that is not a multiple of 128 still uses masked
    # partial stores on the trailing lanes; a feature-axis pad + mask would fix it.

    if pad_rows_tail:
        x2 = jnp.pad(x2, ((0, pad_rows_tail), (0, 0)))
    total_rows = rows + pad_rows_tail
    width = fold * emb_dim
    super_rows = total_rows // fold
    x3 = x2.reshape(super_rows, width)            # contiguous merge: free reshape

    scale2 = jnp.tile(scale.reshape(1, emb_dim), (1, fold))
    shift2 = jnp.tile(shift.reshape(1, emb_dim), (1, fold))

    # ---- Generation-aware tile / VMEM budget --------------------------------
    try:
        vmem_cap = int(pltpu.get_tpu_info().vmem_capacity_bytes)
    except Exception:
        vmem_cap = 64 * 1024 * 1024               # conservative (v7x-class)
    if vmem_cap <= 96 * 1024 * 1024:              # v7x: 64 MiB per TensorCore
        max_tile_bytes = 4 * 1024 * 1024          # 2x in + 2x out + f32 temps < 48 MiB
        vmem_limit = 48 * 1024 * 1024
    else:                                         # v5e / v6e: 128 MiB VMEM
        max_tile_bytes = 8 * 1024 * 1024
        vmem_limit = 96 * 1024 * 1024

    dtype_bytes = jnp.dtype(x.dtype).itemsize
    sublane = 8 if dtype_bytes >= 4 else (16 if dtype_bytes == 2 else 32)

    # Row tile: bounded by bytes (mem-bound kernel -> big tiles), sublane
    # aligned, never larger than the sublane-rounded problem itself.
    br = max(sublane, min(8192, max_tile_bytes // max(width * dtype_bytes, 1)))
    br = max(sublane, (br // sublane) * sublane)
    rounded_rows = ((super_rows + sublane - 1) // sublane) * sublane
    br = min(br, rounded_rows)

    grid = (pl.cdiv(super_rows, br),)             # ragged last block is fine

    if fold > 1:
        lane_seg = jnp.arange(width, dtype=jnp.int32) // emb_dim
        seg = (lane_seg[:, None] == lane_seg[None, :]).astype(jnp.float32)
        kernel = functools.partial(_layernorm_kernel_packed, eps=eps,
                                   emb_dim=emb_dim)
        in_specs = [
            pl.BlockSpec((br, width), lambda i: (i, 0)),
            pl.BlockSpec((1, width), lambda i: (0, 0)),
            pl.BlockSpec((1, width), lambda i: (0, 0)),
            pl.BlockSpec((width, width), lambda i: (0, 0)),   # resident seg matrix
        ]
        operands = (x3, scale2, shift2, seg)
    else:
        kernel = functools.partial(_layernorm_kernel_fold1, eps=eps,
                                   emb_dim=emb_dim)
        in_specs = [
            pl.BlockSpec((br, width), lambda i: (i, 0)),
            pl.BlockSpec((1, width), lambda i: (0, 0)),
            pl.BlockSpec((1, width), lambda i: (0, 0)),
        ]
        operands = (x3, scale2, shift2)

    out = pl.pallas_call(
        kernel,
        out_shape=jax.ShapeDtypeStruct((super_rows, width), x.dtype),
        grid_spec=pltpu.PrefetchScalarGridSpec(
            num_scalar_prefetch=0,
            grid=grid,
            in_specs=in_specs,
            out_specs=pl.BlockSpec((br, width), lambda i: (i, 0)),
        ),
        compiler_params=pltpu.CompilerParams(
            dimension_semantics=("parallel",),
            vmem_limit_bytes=vmem_limit,
        ),
    )(*operands)

    out = out.reshape(total_rows, emb_dim)
    if pad_rows_tail:
        out = out[:rows]
    return out.reshape(orig_shape)


if __name__ == "__main__":
    key = jax.random.PRNGKey(0)
    batch, seq, emb_dim = 2, 8, 32

    x = jax.random.normal(key, (batch, seq, emb_dim), dtype=jnp.float32)

    # Parameter init matching the PyTorch module's __init__ (both ones).
    scale = jnp.ones((emb_dim,), dtype=jnp.float32)
    shift = jnp.ones((emb_dim,), dtype=jnp.float32)

    out = layernorm_pallas(x, scale, shift, eps=1e-5)
    out = jax.block_until_ready(out)

    # Reference (pure JAX, unbiased variance matching torch.var's default).
    mean = jnp.mean(x, axis=-1, keepdims=True)
    var = jnp.sum((x - mean) ** 2, axis=-1, keepdims=True) / (emb_dim - 1)
    ref = scale * ((x - mean) / jnp.sqrt(var + 1e-5)) + shift

    assert out.shape == x.shape
    max_err = float(jnp.max(jnp.abs(out - ref)))
    assert jnp.allclose(out, ref, atol=1e-4, rtol=1e-4), max_err

    print("KERNEL_OK")
</pallas_src>

<mosaic_0001>
module attributes {stable_mosaic.version = 11 : i64} {
  func.func @_layernorm_kernel_packed(%arg0: i32, %arg1: memref<8x128xf32, #tpu.memory_space<vmem>>, %arg2: memref<1x128xf32, #tpu.memory_space<vmem>>, %arg3: memref<1x128xf32, #tpu.memory_space<vmem>>, %arg4: memref<128x128xf32, #tpu.memory_space<vmem>>, %arg5: memref<8x128xf32, #tpu.memory_space<vmem>>) attributes {dimension_semantics = [#tpu.dimension_semantics<parallel>], iteration_bounds = array<i64: 1>, scalar_prefetch = 0 : i64, scratch_operands = 0 : i64, tpu.core_type = #tpu.core_type<tc>, window_params = [{transform_indices = @transform_0, window_bounds = array<i64: 8, 128>}, {pipeline_mode = #tpu.pipeline_mode<synchronous>, transform_indices = @transform_1, window_bounds = array<i64: 1, 128>}, {pipeline_mode = #tpu.pipeline_mode<synchronous>, transform_indices = @transform_2, window_bounds = array<i64: 1, 128>}, {pipeline_mode = #tpu.pipeline_mode<synchronous>, transform_indices = @transform_3, window_bounds = array<i64: 128, 128>}, {transform_indices = @transform_4, window_bounds = array<i64: 8, 128>}]} {
    %c0 = arith.constant 0 : index
    %c0_0 = arith.constant 0 : index
    %0 = vector.load %arg1[%c0, %c0_0] : memref<8x128xf32, #tpu.memory_space<vmem>>, vector<8x128xf32>
    %c0_1 = arith.constant 0 : index
    %c0_2 = arith.constant 0 : index
    %1 = vector.load %arg4[%c0_1, %c0_2] : memref<128x128xf32, #tpu.memory_space<vmem>>, vector<128x128xf32>
    %cst = arith.constant dense<0.000000e+00> : vector<8x128xf32>
    %2 = tpu.matmul %0, %1, %cst {dimension_numbers = #tpu.dot_dimension_numbers<[1], [0], [0], [1], [0, 0, 1, 1], [], []>} : vector<8x128xf32>, vector<128x128xf32>, vector<8x128xf32> -> vector<8x128xf32>
    %3 = arith.mulf %0, %0 : vector<8x128xf32>
    %cst_3 = arith.constant dense<0.000000e+00> : vector<8x128xf32>
    %4 = tpu.matmul %3, %1, %cst_3 {dimension_numbers = #tpu.dot_dimension_numbers<[1], [0], [0], [1], [0, 0, 1, 1], [], []>} : vector<8x128xf32>, vector<128x128xf32>, vector<8x128xf32> -> vector<8x128xf32>
    %cst_4 = arith.constant 3.125000e-02 : f32
    %5 = vector.broadcast %cst_4 : f32 to vector<8x128xf32>
    %6 = arith.mulf %2, %5 : vector<8x128xf32>
    %7 = arith.mulf %6, %2 : vector<8x128xf32>
    %8 = arith.subf %4, %7 : vector<8x128xf32>
    %cst_5 = arith.constant 0.0322580636 : f32
    %9 = vector.broadcast %cst_5 : f32 to vector<8x128xf32>
    %10 = arith.mulf %8, %9 : vector<8x128xf32>
    %cst_6 = arith.constant 9.99999974E-6 : f32
    %11 = vector.broadcast %cst_6 : f32 to vector<8x128xf32>
    %12 = arith.addf %10, %11 : vector<8x128xf32>
    %13 = math.rsqrt %12 : vector<8x128xf32>
    %c0_7 = arith.constant 0 : index
    %c0_8 = arith.constant 0 : index
    %14 = vector.load %arg2[%c0_7, %c0_8] : memref<1x128xf32, #tpu.memory_space<vmem>>, vector<1x128xf32>
    %c0_9 = arith.constant 0 : index
    %c0_10 = arith.constant 0 : index
    %15 = vector.load %arg3[%c0_9, %c0_10] : memref<1x128xf32, #tpu.memory_space<vmem>>, vector<1x128xf32>
    %16 = arith.subf %0, %6 : vector<8x128xf32>
    %17 = arith.mulf %16, %13 : vector<8x128xf32>
    %18 = vector.broadcast %14 : vector<1x128xf32> to vector<8x128xf32>
    %19 = arith.mulf %17, %18 : vector<8x128xf32>
    %20 = vector.broadcast %15 : vector<1x128xf32> to vector<8x128xf32>
    %21 = arith.addf %19, %20 : vector<8x128xf32>
    %c0_11 = arith.constant 0 : index
    %c0_12 = arith.constant 0 : index
    %22 = vector.load %arg5[%c0_11, %c0_12] : memref<8x128xf32, #tpu.memory_space<vmem>>, vector<8x128xf32>
    tpu.vector_store %arg5[%c0_11, %c0_12], %21 {strides = array<i32>} : memref<8x128xf32, #tpu.memory_space<vmem>>, vector<8x128xf32>,
    return
  }
  func.func @transform_0(%arg0: i32) -> (i32, i32) {
    %c0_i32 = arith.constant 0 : i32
    %c0_i32_0 = arith.constant 0 : i32
    return %arg0, %c0_i32 : i32, i32
  }
  func.func @transform_1(%arg0: i32) -> (i32, i32) {
    %c0_i32 = arith.constant 0 : i32
    %c0_i32_0 = arith.constant 0 : i32
    %c0_i32_1 = arith.constant 0 : i32
    return %c0_i32, %c0_i32_0 : i32, i32
  }
  func.func @transform_2(%arg0: i32) -> (i32, i32) {
    %c0_i32 = arith.constant 0 : i32
    %c0_i32_0 = arith.constant 0 : i32
    %c0_i32_1 = arith.constant 0 : i32
    return %c0_i32, %c0_i32_0 : i32, i32
  }
  func.func @transform_3(%arg0: i32) -> (i32, i32) {
    %c0_i32 = arith.constant 0 : i32
    %c0_i32_0 = arith.constant 0 : i32
    %c0_i32_1 = arith.constant 0 : i32
    return %c0_i32, %c0_i32_0 : i32, i32
  }
  func.func @transform_4(%arg0: i32) -> (i32, i32) {
    %c0_i32 = arith.constant 0 : i32
    %c0_i32_0 = arith.constant 0 : i32
    return %arg0, %c0_i32 : i32, i32
  }
}

</mosaic_0001>

<bundles_post_ra>
// kernel: tpu_custom_call.1
= control target key start
LH: loop header
LB: loop body
LE: loop exit
PB: predicated region body
PF: predicated region fallthrough
CT: control target
= control target key end

     0   :  { %9 = vsyncpa [#allocation3], 0  ;;  %s337_s0 = inlined_call_operand.hbm [shape: f32[4,128], index: 0, kind: input, shape index: {}]   ;;  %s338_s1 = inlined_call_operand.hbm [shape: f32[1,128], index: 1, kind: input, shape index: {}]   ;;  %s339_s2 = inlined_call_operand.vmem [shape: f32[1,128], index: 2, kind: input, shape index: {}]   ;;  %s340_s3 = inlined_call_operand.hbm [shape: f32[128,128], index: 3, kind: input, shape index: {}]   ;;  %s341_s4 = inlined_call_operand.hbm [shape: f32[4,128], index: 4, kind: output, shape index: {}]  }
   0x1   :  { %10 = vsyncpa [#allocation6], 0 }
   0x2   :  { %11 = vsyncpa [#allocation4], 0  ;;  %s30_s17 = sshll.u32 %s338_s1, 4  ;;  %s31_s17 = int_to_ptr.hbm [resolvable:$true] %s30_s17 }
   0x3   :  { %15 = vsyncadd [#allocation3], 64  ;;  %s283_s18 = smov [#allocation5]   ;;  %s16_s22 = sshll.u32 %s337_s0, 4  ;;  %s17_s22 = int_to_ptr.hbm [resolvable:$true] %s16_s22 }
   0x4   :  { %s32_s19 = sshll.u32 %s283_s18, 4  ;;  %s284_s23 = smov [#allocation2]   ;;  %s33_s19 = int_to_ptr.vmem [resolvable:$true] %s32_s19 }
   0x5   :  { %35 = dma.hbm_to_vmem [thread:$0]  %s31_s17, 16, %s33_s19, [#allocation6]  }
   0x6   :  { %s18_s24 = sshll.u32 %s284_s23, 4  ;;  %s285_s25 = smov 64   ;;  %s19_s24 = int_to_ptr.vmem [resolvable:$true] %s18_s24 }
   0x7   :  { %s286_s26 = smov 4   ;;  %s42_s28 = sshll.u32 %s340_s3, 4  ;;  %s43_s28 = int_to_ptr.hbm [resolvable:$true] %s42_s28 }
   0x8   :  { %24 = dma.hbm_to_vmem [thread:$0]  %s17_s22, 64, %s19_s24, [#allocation3], %s285_s25, %s285_s25, %s286_s26  }
   0x9   :  { %s287_s29 = smov [#allocation7]   ;;  %s288_s0 = smov 128  }
   0xa   :  { %s44_s30 = sshll.u32 %s287_s29, 4  ;;  %s289_s5 = smov 8   ;;  %s45_s30 = int_to_ptr.vmem [resolvable:$true] %s44_s30 }
   0xb   :  { %50 = dma.hbm_to_vmem [thread:$0]  %s43_s28, 2048, %s45_s30, [#allocation6], %s288_s0, %s288_s0, %s289_s5  }
   0xc   :  { %277 = dma.done.wait [#allocation3], 128  }
   0xd   :  { %278 = vsyncadd [#allocation3], 4294967168 }
   0xe   :  { %279 = dma.done.wait [#allocation6], 2064  }
   0xf   :  { %280 = vsyncadd [#allocation6], 4294965232  ;;  %v79_v0 = vld [vmem:[#allocation7 + $0x78] sm:$0xff]  ;;  %v78_v1 = vld [vmem:[#allocation7 + $0x70] sm:$0xff] }
  0x10   :  { %80 = vmatpush.msra.mxu0 %v79_v0  ;;  %101 = vmatpush.msra.mxu1 %v79_v0  ;;  %v77_v2 = vld [vmem:[#allocation7 + $0x68] sm:$0xff]  ;;  %v76_v3 = vld [vmem:[#allocation7 + $0x60] sm:$0xff]  ;;  %v75_v4 = vld [vmem:[#allocation7 + $0x58] sm:$0xff] }
  0x11   :  { %v74_v5 = vld [vmem:[#allocation7 + $0x50] sm:$0xff]  ;;  %v73_v6 = vld [vmem:[#allocation7 + $0x48] sm:$0xff]  ;;  %v72_v7 = vld [vmem:[#allocation7 + $0x40] sm:$0xff] }
  0x12   :  { %81 = vmatpush.msra.mxu0 %v78_v1  ;;  %102 = vmatpush.msra.mxu1 %v78_v1  ;;  %v71_v8 = vld [vmem:[#allocation7 + $0x38] sm:$0xff]  ;;  %v70_v9 = vld [vmem:[#allocation7 + $0x30] sm:$0xff]  ;;  %v69_v10 = vld [vmem:[#allocation7 + $0x28] sm:$0xff] }
  0x13   :  { %v68_v11 = vld [vmem:[#allocation7 + $0x20] sm:$0xff]  ;;  %v67_v12 = vld [vmem:[#allocation7 + $0x18] sm:$0xff]  ;;  %v66_v13 = vld [vmem:[#allocation7 + $0x10] sm:$0xff] }
  0x14   :  { %82 = vmatpush.msra.mxu0 %v77_v2  ;;  %103 = vmatpush.msra.mxu1 %v77_v2  ;;  %v65_v14 = vld [vmem:[#allocation7 + $0x8] sm:$0xff]  ;;  %v63_v15 = vld [vmem:[#allocation2] sm:$0xff]  ;;  %v64_v16 = vld [vmem:[#allocation7] sm:$0xff] }
  0x15   :  { %v100_v17 = vmul.f32 %v63_v15, %v63_v15  ;;  %v177_v32 = vld [vmem:[#allocation5] ss:$0 sm:$0xff]  ;;  %v178_v35 = vld [vmem:[%s339_s2] ss:$0 sm:$0xff] }
  0x16   :  { %83 = vmatpush.msra.mxu0 %v76_v3  ;;  %104 = vmatpush.msra.mxu1 %v76_v3 }
  0x18   :  { %84 = vmatpush.msra.mxu0 %v75_v4  ;;  %105 = vmatpush.msra.mxu1 %v75_v4 }
  0x1a   :  { %85 = vmatpush.msra.mxu0 %v74_v5  ;;  %106 = vmatpush.msra.mxu1 %v74_v5 }
  0x1c   :  { %86 = vmatpush.msra.mxu0 %v73_v6  ;;  %107 = vmatpush.msra.mxu1 %v73_v6 }
  0x1e   :  { %87 = vmatpush.msra.mxu0 %v72_v7  ;;  %108 = vmatpush.msra.mxu1 %v72_v7 }
  0x20   :  { %88 = vmatpush.msra.mxu0 %v71_v8  ;;  %109 = vmatpush.msra.mxu1 %v71_v8 }
  0x22   :  { %89 = vmatpush.msra.mxu0 %v70_v9  ;;  %110 = vmatpush.msra.mxu1 %v70_v9 }
  0x24   :  { %90 = vmatpush.msra.mxu0 %v69_v10  ;;  %111 = vmatpush.msra.mxu1 %v69_v10 }
  0x26   :  { %91 = vmatpush.msra.mxu0 %v68_v11  ;;  %112 = vmatpush.msra.mxu1 %v68_v11 }
  0x28   :  { %92 = vmatpush.msra.mxu0 %v67_v12  ;;  %113 = vmatpush.msra.mxu1 %v67_v12 }
  0x2a   :  { %93 = vmatpush.msra.mxu0 %v66_v13  ;;  %114 = vmatpush.msra.mxu1 %v66_v13 }
  0x2c   :  { %94 = vmatpush.msra.mxu0 %v65_v14  ;;  %115 = vmatpush.msra.mxu1 %v65_v14 }
  0x2e   :  { %95 = vmatpush.msra.mxu0 %v64_v16  ;;  %116 = vmatpush.msra.mxu1 %v64_v16 }
  0x2f   :  { %96 = vmatmul.f32.vlgmr.msra.gmra.mxu0 %v63_v15  ;;  %117 = vmatmul.f32.vlgmr.msra.gmra.mxu1 %v100_v17 }
  0xac   :  { %v97_v18 = vpop.f32.mrf.mxu0  ;;  %v118_v20 = vpop.f32.mrf.mxu1 }
  0xad   :  { %v121_v19 = vmul.f32 0.03125, %v97_v18 }
  0xaf   :  { %v122_v21 = vmul.f32 %v121_v19, %v97_v18  ;;  %v138_v31 = vsub.f32 %v63_v15, %v121_v19 }
  0xb1   :  { %v123_v22 = vsub.f32 %v118_v20, %v122_v21 }
  0xb3   :  { %v124_v23 = vmul.f32 0.032258064, %v123_v22 }
  0xb5   :  { %v125_v24 = vadd.f32 1e-05, %v124_v23 }
  0xb7   :  { %179 = vrsqrt.f32 %v125_v24  ;;  %vm132_vm1 = vweird.f32 %v125_v24 }
  0xbd   :  { %v180_v25 = vpop.eup %179 }
  0xbe   :  { %v127_v26 = vmul.f32 %v180_v25, %v125_v24  ;;  %vm133_vm0 = vweird.f32 %v180_v25 }
  0xbf   :  { %vm134_vm2 = vmor %vm132_vm1, %vm133_vm0 }
  0xc0   :  { %v128_v27 = vmul.f32 %v180_v25, %v127_v26 }
  0xc2   :  { %v129_v28 = vmul.f32 0.5, %v128_v27 }
  0xc4   :  { %v130_v29 = vsub.f32 1.5, %v129_v28 }
  0xc6   :  { %v131_v30 = vmul.f32 %v180_v25, %v130_v29 }
  0xc8   :  { %v135_v33 = vsel %vm134_vm2, %v180_v25, %v131_v30 }
  0xc9   :  { %v139_v34 = vmul.f32 %v138_v31, %v135_v33 }
  0xcb   :  { %v143_v36 = vmul.f32 %v177_v32, %v139_v34 }
  0xcd   :  { %v147_v37 = vadd.f32 %v178_v35, %v143_v36 }
  0xcf   :  { %148 = vst [vmem:[#allocation8] sm:$0xff] %v147_v37 }
  0xd0   :  { %152 = vsyncadd [#allocation4], 64  ;;  %s155_s9 = sshll.u32 %s341_s4, 4  ;;  %s290_s10 = smov [#allocation8]   ;;  %s156_s9 = int_to_ptr.hbm [resolvable:$true] %s155_s9 }
  0xd1   :  { %s153_s11 = sshll.u32 %s290_s10, 4  ;;  %s154_s11 = int_to_ptr.vmem [resolvable:$true] %s153_s11 }
  0xd2   :  { %161 = dma.vmem_to_hbm [thread:$0]  %s154_s11, 64, %s156_s9, [#allocation4], %s285_s25, %s285_s25, %s286_s26  }
  0xd3   :  { %281 = dma.done.wait [#allocation4], 128  }
  0xd4   :  { %282 = vsyncadd [#allocation4], 4294967168 }
  0xd5   :  { %166 = vsyncpa [#allocation3], 1 }
  0xd6   :  { %167 = vsyncpa [#allocation6], 1 }
  0xd7   :  { %168 = vsyncpa [#allocation4], 1 }

</bundles_post_ra>
